<compile_context>
chip_gen: v6e
topology: v6e:2x2x1
jax: 0.10.0
libtpu: 0.0.40
codegen_flags: <defaults>
</compile_context>

<pallas_src>
import functools
import math

import jax
import jax.numpy as jnp
from jax import lax
from jax.experimental import pallas as pl
from jax.experimental.pallas import tpu as pltpu

_LANE = 128
_SUBLANE = 8
_MAX_BLOCK_BYTES = 8 * 1024 * 1024   # per output block; 2x double-buffer ~16 MiB
_MAX_FLAT_LANES = 8 * _LANE          # widest lane-dense flat slab we will emit
_TARGET_GRID_STEPS = 4               # lets v7x's 2 TCs both get work


def _cdiv(a: int, b: int) -> int:
    return -(-a // b)


def _round_up(a: int, b: int) -> int:
    return _cdiv(a, b) * b


def _pe_kernel(params_ref, o_ref):
    # params_ref: (2, C) f32   row 0: a = pos_per_row * inv_scale
    #                          row 1: b = pos_off * inv_scale + phase
    # o_ref:      (row_blk, C) tile of the flat encoding slab.
    row_blk, c = o_ref.shape
    row0 = (pl.program_id(0) * row_blk).astype(jnp.float32)

    p = params_ref[...]                 # (2, C)
    a = p[0:1, :]                       # (1, C), broadcast over sublanes
    b_tile = p[1:2, :] + row0 * a       # (1, C) per-tile bias, computed once

    # Local row index within the tile (int32 iota is exact; single cast/vreg).
    i = lax.broadcasted_iota(jnp.int32, (row_blk, c), 0).astype(jnp.float32)

    # angle = (row0 + i) * pos_per_row * inv_scale + pos_off * inv_scale + phase
    #       = i * a + b_tile
    # sin(angle) for even dims; sin(angle + pi/2) == cos(angle) for odd dims.
    o_ref[...] = jnp.sin(i * a + b_tile).astype(o_ref.dtype)


def build_positional_encoding(max_len: int, d_model: int,
                              out_dtype=jnp.float32) -> jax.Array:
    """Compute the (max_len, d_model) sinusoidal table with a Pallas kernel."""
    # ---- layout selection -------------------------------------------------
    # Emit a lane-dense flat slab of width C (multiple of 128) holding
    # C/d_model positions per flat row whenever lcm(d_model, 128) is modest;
    # this keeps every store an unmasked full-lane vst.  Otherwise fall back
    # to C == d_model (block last dim equals the full array dim, so it is
    # still a legal BlockSpec, just with masked tail stores).
    if d_model % _LANE == 0:
        c = d_model
        pos_per_row = 1
    else:
        l = math.lcm(d_model, _LANE)
        if l <= _MAX_FLAT_LANES:
            c = l
            pos_per_row = c // d_model
        else:
            # Performance cliff (masked tail stores) but still correct.
            c = d_model
            pos_per_row = 1

    n_rows = _cdiv(max_len, pos_per_row)

    # ---- tiling -----------------------------------------------------------
    # Large blocks to amortize per-step pipeline overhead, capped by VMEM
    # budget, and kept small enough that the grid has >= ~4 steps when the
    # table is big (so v7x's two TensorCores can split the parallel axis).
    bytes_per_row = c * jnp.dtype(out_dtype).itemsize
    max_rows_by_vmem = max(_SUBLANE, _MAX_BLOCK_BYTES // bytes_per_row)
    rows_for_target = _round_up(_cdiv(n_rows, _TARGET_GRID_STEPS), _SUBLANE)
    row_blk = min(2048, max_rows_by_vmem, rows_for_target)
    row_blk = max(_SUBLANE, _round_up(row_blk, _SUBLANE))
    padded_rows = _round_up(n_rows, row_blk)
    grid = (padded_rows // row_blk,)

    # ---- column-only parameters (computed once, outside the kernel) -------
    col = jnp.arange(c, dtype=jnp.int32)
    dim = col % d_model
    pos_off = (col // d_model).astype(jnp.float32)
    two_i = (2 * (dim // 2)).astype(jnp.float32)
    inv_scale = 1.0 / (jnp.float32(10000.0) ** (two_i / jnp.float32(d_model)))
    phase = (dim % 2).astype(jnp.float32) * jnp.float32(math.pi / 2.0)
    a_col = jnp.float32(pos_per_row) * inv_scale
    b_col = pos_off * inv_scale + phase
    params = jnp.stack([a_col, b_col], axis=0)               # (2, C) f32

    block_bytes = row_blk * c * jnp.dtype(out_dtype).itemsize
    vmem_limit = max(32 * 1024 * 1024, 2 * block_bytes + 4 * 1024 * 1024)

    flat = pl.pallas_call(
        _pe_kernel,
        out_shape=jax.ShapeDtypeStruct((padded_rows, c), out_dtype),
        grid=grid,
        in_specs=[pl.BlockSpec((2, c), lambda i: (0, 0))],
        out_specs=pl.BlockSpec((row_blk, c), lambda i: (i, 0)),
        compiler_params=pltpu.CompilerParams(
            dimension_semantics=("parallel",),
            vmem_limit_bytes=vmem_limit,
        ),
    )(params)

    if pos_per_row == 1:
        return flat[:max_len, :]
    # Each flat row holds pos_per_row consecutive positions; the reshape is a
    # row-major no-op, then drop the padded tail positions.
    table = flat.reshape(padded_rows * pos_per_row, d_model)
    return table[:max_len, :]


class PositionalEncoding:
    """JAX/Pallas equivalent of the PyTorch PositionalEncoding module."""

    def __init__(self, d_model: int, max_len: int, out_dtype=jnp.float32):
        self.d_model = d_model
        self.max_len = max_len
        # Precompute the table on-device (mirrors PyTorch __init__).
        self.encoding = build_positional_encoding(max_len, d_model, out_dtype)
        self._slice_cache = {}

    def __call__(self, x: jax.Array) -> jax.Array:
        # x: (batch_size, seq_len); only the static seq_len is used.
        _, seq_len = x.shape
        if seq_len not in self._slice_cache:
            self._slice_cache[seq_len] = self.encoding[:seq_len, :]
        return self._slice_cache[seq_len]


def _reference_encoding(max_len: int, d_model: int) -> jnp.ndarray:
    """Pure-JAX reference identical to the PyTorch __init__ math."""
    pos = jnp.arange(max_len, dtype=jnp.float32)[:, None]
    _2i = jnp.arange(0, d_model, 2, dtype=jnp.float32)
    enc = jnp.zeros((max_len, d_model), jnp.float32)
    enc = enc.at[:, 0::2].set(jnp.sin(pos / 10000.0 ** (_2i / d_model)))
    enc = enc.at[:, 1::2].set(jnp.cos(pos / 10000.0 ** (_2i / d_model)))
    return enc


if __name__ == "__main__":
    d_model = 32
    max_len = 64
    batch_size, seq_len = 2, 8

    key = jax.random.PRNGKey(0)
    # Token-id style input; only its shape matters for forward().
    x = jax.random.randint(key, (batch_size, seq_len), 0, 1000, dtype=jnp.int32)

    pe = PositionalEncoding(d_model=d_model, max_len=max_len)
    out = pe(x)
    out = jax.block_until_ready(out)

    assert out.shape == (seq_len, d_model), out.shape
    assert out.dtype == jnp.float32, out.dtype

    ref = _reference_encoding(max_len, d_model)[:seq_len, :]
    assert jnp.allclose(out, ref, atol=1e-4, rtol=1e-5), "mismatch vs reference"

    full_ref = _reference_encoding(max_len, d_model)
    assert jnp.allclose(pe.encoding, full_ref, atol=1e-4, rtol=1e-5), \
        "full-table mismatch"

    # Exercise the c == d_model (multiple of 128) path.
    t128 = jax.block_until_ready(build_positional_encoding(40, 128))
    assert jnp.allclose(t128, _reference_encoding(40, 128),
                        atol=1e-4, rtol=1e-5), "d_model=128 mismatch"

    # Exercise the lcm-based lane-dense path (d_model=96 -> C=384).
    t96 = jax.block_until_ready(build_positional_encoding(50, 96))
    assert jnp.allclose(t96, _reference_encoding(50, 96),
                        atol=1e-4, rtol=1e-5), "d_model=96 mismatch"

    print("KERNEL_OK")
</pallas_src>

<mosaic_0001>
module attributes {stable_mosaic.version = 11 : i64} {
  func.func @_pe_kernel(%arg0: i32, %arg1: memref<2x128xf32, #tpu.memory_space<vmem>>, %arg2: memref<8x128xf32, #tpu.memory_space<vmem>>) attributes {dimension_semantics = [#tpu.dimension_semantics<parallel>], iteration_bounds = array<i64: 2>, scalar_prefetch = 0 : i64, scratch_operands = 0 : i64, tpu.core_type = #tpu.core_type<tc>, window_params = [{pipeline_mode = #tpu.pipeline_mode<synchronous>, transform_indices = @transform_0, window_bounds = array<i64: 2, 128>}, {transform_indices = @transform_1, window_bounds = array<i64: 8, 128>}]} {
    %c8_i32 = arith.constant 8 : i32
    %0 = arith.muli %arg0, %c8_i32 : i32
    %1 = arith.sitofp %0 : i32 to f32
    %c0 = arith.constant 0 : index
    %c0_0 = arith.constant 0 : index
    %2 = vector.load %arg1[%c0, %c0_0] : memref<2x128xf32, #tpu.memory_space<vmem>>, vector<2x128xf32>
    %3 = vector.extract_strided_slice %2 {offsets = [0, 0], sizes = [1, 128], strides = [1, 1]} : vector<2x128xf32> to vector<1x128xf32>
    %4 = vector.extract_strided_slice %2 {offsets = [1, 0], sizes = [1, 128], strides = [1, 1]} : vector<2x128xf32> to vector<1x128xf32>
    %5 = vector.broadcast %1 : f32 to vector<1x128xf32>
    %6 = arith.mulf %5, %3 : vector<1x128xf32>
    %7 = arith.addf %4, %6 : vector<1x128xf32>
    %8 = tpu.iota {dimensions = array<i32: 0>} : vector<8x128xi32>
    %9 = arith.sitofp %8 : vector<8x128xi32> to vector<8x128xf32>
    %10 = vector.broadcast %3 : vector<1x128xf32> to vector<8x128xf32>
    %11 = arith.mulf %9, %10 : vector<8x128xf32>
    %12 = vector.broadcast %7 : vector<1x128xf32> to vector<8x128xf32>
    %13 = arith.addf %11, %12 : vector<8x128xf32>
    %14 = math.sin %13 : vector<8x128xf32>
    %c0_1 = arith.constant 0 : index
    %c0_2 = arith.constant 0 : index
    %15 = vector.load %arg2[%c0_1, %c0_2] : memref<8x128xf32, #tpu.memory_space<vmem>>, vector<8x128xf32>
    tpu.vector_store %arg2[%c0_1, %c0_2], %14 {strides = array<i32>} : memref<8x128xf32, #tpu.memory_space<vmem>>, vector<8x128xf32>,
    return
  }
  func.func @transform_0(%arg0: i32) -> (i32, i32) {
    %c0_i32 = arith.constant 0 : i32
    %c0_i32_0 = arith.constant 0 : i32
    %c0_i32_1 = arith.constant 0 : i32
    return %c0_i32, %c0_i32_0 : i32, i32
  }
  func.func @transform_1(%arg0: i32) -> (i32, i32) {
    %c0_i32 = arith.constant 0 : i32
    %c0_i32_0 = arith.constant 0 : i32
    return %arg0, %c0_i32 : i32, i32
  }
}

</mosaic_0001>

<bundles_post_ra>
// kernel: tpu_custom_call.1
= control target key start
LH: loop header
LB: loop body
LE: loop exit
PB: predicated region body
PF: predicated region fallthrough
CT: control target
= control target key end

     0   :  { %6 = vsyncpa [#allocation3], 0  ;;  %s625_s0 = inlined_call_operand.hbm [shape: f32[2,128], index: 0, kind: input, shape index: {}]   ;;  %s626_s1 = inlined_call_operand.hbm [shape: f32[16,128], index: 1, kind: output, shape index: {}]  }
   0x1   :  { %7 = vsyncpa [#allocation4], 0 }
   0x2   :  { %9 = vsyncpa [#allocation4 + $0x1], 0  ;;  %s497_s6 = smov 0   ;;  %s499_s7 = smov 0  }
   0x3   :  { %s501_s8 = smov 0   ;;  %s503_s9 = smov 0  }
   0x4 LB: > { %s518_s10 = sadd.s32 4294967295, %s477_s9   ;;  %s308_s11 = sadd.s32 4294967294, %s477_s9   ;;  %s477_s9 = sphi %s503_s9, %s634_s9   ;;  %s473_s8 = sphi %s501_s8, %s633_s8   ;;  %s469_s7 = sphi %s499_s7, %s632_s7   ;;  %s465_s6 = sphi %s497_s6, %s631_s6  }
   0x5   : > { %s522_s12 = sadd.s32 1, %s477_s9   ;;  %s43_s13 = sadd.s32 1, %s473_s8 }
   0x6   : > { %s40_s14 = ssub.s32 %s477_s9, %s522_s12  ;;  %p53_p0 = scmp.ne.s32.totalorder %s473_s8, %s469_s7 }
   0x7   : > { %p41_p1 = scmp.eq.s32.totalorder %s40_s14, 0  ;;  %p54_p2 = scmp.eq.s32.totalorder %s518_s10, 1 }
   0x8   : > { %p59_p3 = scmp.ne.s32.totalorder %s469_s7, %s465_s6  ;;  %p60_p4 = scmp.eq.s32.totalorder %s308_s11, 1 }
   0x9   : > { %s533_s15 = scalar_select %p41_p1, %s473_s8, %s43_s13  }
   0xa   : > { %p535_p5 = por %p54_p2, %p53_p0  ;;  %p539_p6 = por %p60_p4, %p59_p3 }
   0xb   : > { %p309_p7 = scmp.ge.s32.totalorder %s477_s9, 1  ;;  %p67_p8 = scmp.lt.s32.totalorder %s477_s9, 3 }
   0xc   : > { %s628_s17 = scalar_select %p539_p6, 1, 0 }
   0xd   : > { %p341_p9 = scmp.eq.s32.totalorder %s518_s10, 0  ;;  %p546_p10 = pnand %p309_p7, %p67_p8 }
   0xe   : > { %s479_s19 = smov [#allocation2]  }
   0xf   : > { %s80_s20 = sshll.u32 %s479_s19, 4  ;;  %p333_p11 = pneg %p546_p10  ;;  %s81_s20 = int_to_ptr.vmem [resolvable:$true] %s80_s20 }
  0x10   : > { %s398_s21 = scalar_lea.vmem %s81_s20, 32  ;;  %p406_p3 = scmp.lt.s32.totalorder %s81_s20, %s81_s20 }
  0x11   : > { %p334_p12 = pnand %p341_p9, %p333_p11  ;;  %p399_p0 = scmp.ne.s32.totalorder %s81_s20, %s398_s21 }
  0x12   : > { %p407_p4 = scmp.lt.s32.totalorder %s398_s21, %s398_s21 }
  0x13   : > { %p389_p13 = pneg %p334_p12 }
  0x14   : > { %p408_p6 = por %p407_p4, %p406_p3 }
  0x15   : > { %p401_p1 = pnand %p399_p0, %p389_p13 }
  0x17   : > { %p402_p2 = pneg %p401_p1 }
  0x19   : > { %p409_p7 = pnand %p408_p6, %p402_p2 }
  0x1b   : > { %412 = shalt.err (!%p409_p7)
}
  0x1c   : > { %336 = dma.hbm_to_vmem [thread:$0]  (!%p334_p12), %s625_s0, 32, %s81_s20, [#allocation3]  }
  0x1d   : > { %93 = sbr.rel (%p546_p10) target bundleno = 145 (0x91), region = 24 }
  0x22   : > { %456 = dma.done.wait (%p341_p9), [#allocation3], 32  }
  0x23   : > { %458 = vsyncadd (%p341_p9), [#allocation3], 4294967264  ;;  %s314_s24 = sshll.u32 %s518_s10, 3  ;;  %v117_v0 = vlaneseq  ;;  %v110_v4 = vld [vmem:[#allocation2] sm:$0x3]  ;;  %s105_s26 = sand.u32 1, %s469_s7  }
  0x24   : > { %s109_s25 = scvt.s32.f32 %s314_s24  ;;  %v480_v25 = vmov 683565275   ;;  %v481_v27 = vmov 2475754826   ;;  %v482_v29 = vmov 2131351028  }
  0x25   : > { %v118_v1 = vshrl.u32 %v117_v0, 7  ;;  %v483_v31 = vmov 2102212464   ;;  %v484_v33 = vmov 920167782   ;;  %s313_s27 = sshll.u32 %s105_s26, 3 }
  0x26   : > { %v111_v3 = vstv %s109_s25  ;;  %v485_v40 = vmov 1326507024   ;;  %s107_s28 = scalar_lea.vmem [#allocation5], %s313_s27  ;;  %s320_s30 = sshll.u32 %s518_s10, 7 }
  0x27   : > { %v122_v2 = vsub.s32 0, %v118_v1  ;;  %v112_v5 = vmul.f32 %v111_v3, %v110_v4  ;;  %v119_v7 = vcvt.s32.f32 %v118_v1  ;;  %v127_v9 = vsub.s32 1, %v118_v1  ;;  %s249_s29 = sshll.u32 %s107_s28, 4  ;;  %s247_s4 = scalar_lea.hbm %s626_s1, %s320_s30  ;;  %s587_s29 = int_to_ptr.vmem [resolvable:$true] %s249_s29 }
  0x28   : > { %s236_s5 = scalar_lea.sflag [#allocation4], %s105_s26  ;;  %s413_s11 = scalar_lea.vmem %s587_s29, 128 }
  0x29   : > { %v123_v6 = vrot.slane %v110_v4, %v122_v2  ;;  %v114_v8 = vrot.slane %v112_v5, 7  ;;  %p414_p6 = scmp.ne.s32.totalorder %s587_s29, %s413_s11  ;;  %s486_s10 = smov [#allocation5]  }
  0x2a   : > { %s417_s13 = sshll.u32 %s486_s10, 4  ;;  %s418_s13 = int_to_ptr.vmem [resolvable:$false] %s417_s13 }
  0x2b   : > { %v116_v10 = vadd.f32 %v114_v8, %v110_v4  ;;  %v124_v11 = vmul.f32 %v123_v6, %v119_v7  ;;  %p415_p8 = pnand %p414_p6, %p535_p5  ;;  %s419_s14 = scalar_lea.vmem %s418_s13, 256 }
  0x2c   : > { %p420_p10 = scmp.lt.s32.totalorder %s587_s29, %s418_s13  ;;  %p421_p11 = scmp.lt.s32.totalorder %s419_s14, %s413_s11 }
  0x2d   : > { %v128_v12 = vrot.slane %v116_v10, %v127_v9  ;;  %p416_p9 = pneg %p415_p8 }
  0x2e   : > { %p422_p12 = por %p421_p11, %p420_p10 }
  0x2f   : > { %v564_v13 = vadd.f32 %v128_v12, %v124_v11 }
  0x30   : > { %p423_p13 = pnand %p422_p12, %p416_p9 }
  0x31   : > { %v133_v14 = vand.u32 2139095040, %v564_v13  ;;  %v130_v16 = vand.u32 2147483647, %v564_v13  ;;  %vm132_vm7 = vcmp.lt.s32.totalorder %v564_v13, 0  ;;  %vm222_vm12 = vweird.f32 %v564_v13 }
  0x33   : > { %v134_v15 = vshrl.u32 %v133_v14, 23  ;;  %v137_v19 = vand.u32 8388607, %v130_v16  ;;  %vm131_vm8 = vcmp.le.f32.partialorder %v130_v16, 0.7853982 }
  0x35   : > { %v315_v17 = vadd.s32 4294967169, %v134_v15  ;;  %v138_v22 = vor.u32 8388608, %v137_v19 }
  0x37   : > { %v140_v18 = vadd.s32 1, %v315_v17  ;;  %v178_v42 = vshll.u32 %v138_v22, 8 }
  0x39   : > { %vm141_vm0 = vcmp.gt.s32.totalorder %v140_v18, 0 }
  0x3a   : > { %v142_v20 = vsel %vm141_vm0, %v140_v18, 0 }
  0x3b   : > { %v144_v21 = vand.u32 31, %v142_v20  ;;  %v143_v23 = vshrl.u32 %v142_v20, 5 }
  0x3d   : > { %v145_v24 = vsub.s32 32, %v144_v21  ;;  %v147_v26 = vshll.u32 %v480_v25, %v144_v21  ;;  %v150_v28 = vshll.u32 %v481_v27, %v144_v21  ;;  %v153_v30 = vshll.u32 %v482_v29, %v144_v21 }
  0x3e   : > { %v156_v32 = vshll.u32 %v483_v31, %v144_v21  ;;  %v159_v34 = vshll.u32 %v484_v33, %v144_v21  ;;  %vm162_vm1 = vcmp.lt.s32.totalorder %v143_v23, 1  ;;  %vm165_vm2 = vcmp.lt.s32.totalorder %v143_v23, 4 }
  0x3f   : > { %v146_v35 = vshrl.u32 %v480_v25, %v145_v24  ;;  %v148_v36 = vshrl.u32 %v481_v27, %v145_v24  ;;  %v151_v37 = vshrl.u32 %v482_v29, %v145_v24  ;;  %v154_v38 = vshrl.u32 %v483_v31, %v145_v24 }
  0x40   : > { %v157_v39 = vshrl.u32 %v484_v33, %v145_v24  ;;  %v160_v41 = vshrl.u32 %v485_v40, %v145_v24  ;;  %vm163_vm3 = vcmp.lt.s32.totalorder %v143_v23, 2  ;;  %vm164_vm4 = vcmp.lt.s32.totalorder %v143_v23, 3 }
  0x41   : > { %v149_v43 = vor.u32 %v148_v36, %v147_v26  ;;  %v152_v44 = vor.u32 %v151_v37, %v150_v28  ;;  %v155_v45 = vor.u32 %v154_v38, %v153_v30 }
  0x42   : > { %v158_v46 = vor.u32 %v157_v39, %v156_v32  ;;  %v161_v47 = vor.u32 %v160_v41, %v159_v34 }
  0x43   : > { %v166_v48 = vsel %vm162_vm1, %v146_v35, %v149_v43  ;;  %v167_v49 = vsel %vm165_vm2, %v155_v45, 2102212464  ;;  %v170_v50 = vsel %vm162_vm1, %v149_v43, %v152_v44  ;;  %v174_v51 = vsel %vm162_vm1, %v152_v44, %v155_v45 }
  0x44   : > { %v168_v52 = vsel %vm164_vm4, %v152_v44, %v167_v49  ;;  %v171_v53 = vsel %vm165_vm2, %v158_v46, 920167782  ;;  %v175_v54 = vsel %vm165_vm2, %v161_v47, 1326507024 }
  0x45   : > { %v172_v55 = vsel %vm164_vm4, %v155_v45, %v171_v53  ;;  %v176_v56 = vsel %vm164_vm4, %v158_v46, %v175_v54  ;;  %v169_v57 = vsel %vm163_vm3, %v166_v48, %v168_v52 }
  0x46   : > { %v173_v58 = vsel %vm163_vm3, %v170_v50, %v172_v55  ;;  %v177_v59 = vsel %vm163_vm3, %v174_v51, %v176_v56  ;;  %v185_v0 = vmul.u32 %v178_v42, %v169_v57 }
  0x47   : > { %v570_v60 = vmul.u32.u64.low %v178_v42, %v177_v59  ;;  %v571_v61 = vmul.u32.u64.high %v178_v42, %v177_v59, %v570_v60  ;;  %v573_v62 = vmul.u32.u64.low %v178_v42, %v173_v58  ;;  %v574_v63 = vmul.u32.u64.high %v178_v42, %v173_v58, %v573_v62 }
  0x49   : > { %vm187_vm5 = vc.u32 %v571_v61, %v573_v62  ;;  %v188_v1 = vadd.s32 1, %v574_v63  ;;  %v186_v12 = vadd.s32 %v573_v62, %v571_v61 }
  0x4b   : > { %v189_v2 = vsel %vm187_vm5, %v188_v1, %v574_v63 }
  0x4c   : > { %v190_v3 = vadd.s32 %v189_v2, %v185_v0 }
  0x4e   : > { %v191_v4 = vadd.s32 536870912, %v190_v3 }
  0x50   : > { %v192_v5 = vshrl.u32 %v191_v4, 30 }
  0x52   : > { %v193_v6 = vshll.u32 %v192_v5, 30  ;;  %v216_v27 = vsub.s32 4, %v192_v5 }
  0x54   : > { %v194_v7 = vsub.s32 %v190_v3, %v193_v6  ;;  %v217_v30 = vsel %vm132_vm7, %v216_v27, %v192_v5 }
  0x55   : > { %v219_v32 = vsel %vm131_vm8, 0, %v217_v30 }
  0x56   : > { %v196_v8 = vsub.s32 0, %v194_v7  ;;  %v223_v33 = vadd.s32 3, %v219_v32 }
  0x58   : > { %v316_v9 = vmin.u32 %v196_v8, %v194_v7  ;;  %v224_v34 = vand.u32 3, %v223_v33 }
  0x5a   : > { %v198_v10 = vclz %v316_v9  ;;  %vm229_vm9 = vcmp.eq.s32.totalorder %v224_v34, 2  ;;  %vm226_vm10 = vcmp.eq.s32.totalorder %v224_v34, 0  ;;  %vm225_vm11 = vcmp.lt.s32.totalorder %v224_v34, 2 }
  0x5c   : > { %v317_v11 = vadd.s32 4294967294, %v198_v10 }
  0x5e   : > { %vm318_vm6 = vcmp.lt.s32.totalorder %v317_v11, 0 }
  0x5f   : > { %v201_v14 = vsel %vm318_vm6, 0, %v317_v11 }
  0x60   : > { %v202_v15 = vsub.s32 32, %v201_v14  ;;  %v203_v17 = vshll.u32 %v194_v7, %v201_v14  ;;  %v206_v18 = vsub.s32 4294967266, %v201_v14 }
  0x62   : > { %v204_v19 = vshrl.u32 %v186_v12, %v202_v15  ;;  %v207_v20 = vadd.s32 127, %v206_v18 }
  0x64   : > { %v205_v21 = vor.u32 %v204_v19, %v203_v17  ;;  %v208_v22 = vshll.u32 %v207_v20, 23 }
  0x66   : > { %v209_v23 = vor.u32 4788187, %v208_v22  ;;  %v212_v24 = vcvt.s32.f32 %v205_v21 }
  0x68   : > { %v210_v25 = vand.u32 2147483647, %v209_v23 }
  0x6a   : > { %v213_v26 = vmul.f32 %v212_v24, %v210_v25 }
  0x6c   : > { %v214_v28 = vxor.u32 2147483648, %v213_v26 }
  0x6e   : > { %v215_v29 = vsel %vm132_vm7, %v214_v28, %v213_v26 }
  0x6f   : > { %v218_v31 = vsel %vm131_vm8, %v564_v13, %v215_v29 }
  0x70   : > { %383 = vcosq.f32 %v218_v31 }
  0x71   : > { %385 = vsinq.f32 %v218_v31 }
  0x7d   : > { %v384_v35 = vpop.eup %383 }
  0x7e   : > { %v386_v36 = vpop.eup %385  ;;  %v230_v37 = vxor.u32 2147483648, %v384_v35 }
  0x7f   : > { %v227_v16 = vxor.u32 2147483648, %v386_v36 }
  0x80   : > { %v231_v38 = vsel %vm229_vm9, %v230_v37, %v386_v36 }
  0x81   : > { %v228_v39 = vsel %vm226_vm10, %v384_v35, %v227_v16 }
  0x82   : > { %v232_v40 = vsel %vm225_vm11, %v228_v39, %v231_v38 }
  0x83   : > { %v233_v41 = vsel %vm222_vm12, nan, %v232_v40 }
  0x84   : > { %234 = vst [vmem:[%s107_s28] sm:$0xff] %v233_v41 }
  0x85   : > { %426 = shalt.err (!%p423_p13)
}
  0x86   : > { %s427_s18 = scalar_lea.hbm %s247_s4, 128  ;;  %s431_s21 = scalar_lea.hbm %s626_s1, 256 }
  0x87   : > { %p428_p0 = scmp.ne.s32.totalorder %s247_s4, %s427_s18  ;;  %p432_p3 = scmp.lt.s32.totalorder %s247_s4, %s626_s1 }
  0x88   : > { %p433_p4 = scmp.lt.s32.totalorder %s431_s21, %s427_s18 }
  0x89   : > { %p429_p1 = pnand %p428_p0, %p535_p5 }
  0x8a   : > { %p434_p7 = por %p433_p4, %p432_p3 }
  0x8b   : > { %p430_p2 = pneg %p429_p1 }
  0x8d   : > { %p435_p6 = pnand %p434_p7, %p430_p2 }
  0x8f   : > { %438 = shalt.err (!%p435_p6)
}
  0x90   : > { %331 = dma.vmem_to_hbm [thread:$0]  (%p535_p5), %s587_s29, 128, %s247_s4, %s236_s5  }
  0x91 PF: > { %p343_p8 = scmp.ge.s32.totalorder %s477_s9, 2  ;;  %s261_s24 = sand.u32 1, %s465_s6  }
  0x92   : > { %p630_p9 = scmp.ne.s32.totalorder %s628_s17, 0  ;;  %s262_s25 = scalar_lea.sflag [#allocation4], %s261_s24 }
  0x94   : > { %p338_p10 = pnand %p343_p8, %p630_p9 }
  0x96   : > { %p339_p11 = pneg %p338_p10 }
  0x98   : > { %460 = dma.done.wait (%p339_p11), %s262_s25, 128  }
  0x99   : > { %462 = vsyncadd (%p339_p11), %s262_s25, 4294967168  ;;  %p12_p12 = scmp.ge.s32.totalorder %s522_s12, 4   ;;  %s631_s6 = smov %s469_s7 }
  0x9a   : > { %s632_s7 = smov %s473_s8  ;;  %s633_s8 = smov %s533_s15 }
  0x9b   : > { %s634_s9 = smov %s522_s12  ;;  %14 = sbr.rel (!%p12_p12) target bundleno = 4 (0x4), region = 61 }
  0xa0   :  { %267 = vsyncpa [#allocation3], 1 }
  0xa1   :  { %269 = vsyncpa [#allocation3 + $0x1], 1 }
  0xa2   :  { %270 = vsyncpa [#allocation4], 1 }
  0xa3   :  { %272 = vsyncpa [#allocation4 + $0x1], 1 }

</bundles_post_ra>
